<compile_context>
chip_gen: v5e
topology: v5e:2x2
jax: 0.10.0
libtpu: 0.0.40
codegen_flags: <defaults>
</compile_context>

<pallas_src>
import jax
import jax.numpy as jnp
from jax.experimental import pallas as pl
from jax.experimental.pallas import tpu as pltpu


def _identity_kernel(x_ref, o_ref):
    # Pure pass-through: copy the VMEM tile of the input to the output tile.
    o_ref[...] = x_ref[...]


def _lane_dense_2d(x_flat: jax.Array):
    """Reshape a flat array to (rows, cols) with cols a multiple of 128.

    Pads the flat view when needed so stores are always full-width vst.
    Returns (x2, pad) where `pad` is the number of trailing pad elements.
    """
    total = x_flat.size
    # Prefer a large lane width that divides the total (no padding needed).
    for cw in (4096, 2048, 1024, 512, 256, 128):
        if total >= cw and total % cw == 0:
            return x_flat.reshape(total // cw, cw), 0
    # Otherwise pad up to a multiple of 128 lanes and slice the pad off later.
    lane = 128
    pad = (-total) % lane
    x_flat = jnp.pad(x_flat, (0, pad))
    return x_flat.reshape((total + pad) // lane, lane), pad


def identity_copy(x: jax.Array) -> jax.Array:
    """Materialize a bit-exact copy of `x` with a tuned Pallas copy kernel."""
    orig_shape = x.shape
    if x.size == 0:
        return x

    itemsize = jnp.dtype(x.dtype).itemsize
    x2, pad = _lane_dense_2d(x.reshape(-1))
    R, C = x2.shape

    # dtype-aware sublane alignment (packed sublanes for sub-32-bit dtypes).
    sublane_align = {4: 8, 2: 16, 1: 32}.get(itemsize, 8)

    # Lane (last-dim) tile: full extent if small, else a large multiple of 128.
    LANE_CAP = 4096
    tc = C if C <= LANE_CAP else LANE_CAP

    # Row tile: largest aligned count that keeps one block within ~4 MiB
    # (=> <= ~16 MiB double-buffered in+out, safe on v5e/v6e/v7x).
    BLOCK_BUDGET_BYTES = 4 * 1024 * 1024
    row_budget = max(1, BLOCK_BUDGET_BYTES // max(1, tc * itemsize))
    row_budget = max(sublane_align, (row_budget // sublane_align) * sublane_align)
    tr = R if R <= row_budget else row_budget

    grid = (pl.cdiv(R, tr), pl.cdiv(C, tc))

    out2 = pl.pallas_call(
        _identity_kernel,
        out_shape=jax.ShapeDtypeStruct((R, C), x.dtype),
        grid_spec=pltpu.PrefetchScalarGridSpec(
            num_scalar_prefetch=0,
            grid=grid,
            in_specs=[pl.BlockSpec((tr, tc), lambda i, j: (i, j))],
            out_specs=pl.BlockSpec((tr, tc), lambda i, j: (i, j)),
        ),
        compiler_params=pltpu.CompilerParams(
            dimension_semantics=("parallel", "parallel"),
            vmem_limit_bytes=32 * 1024 * 1024,
        ),
        cost_estimate=pl.CostEstimate(
            flops=0,
            transcendentals=0,
            bytes_accessed=2 * x.size * itemsize,
        ),
    )(x2)

    out_flat = out2.reshape(-1)
    if pad:
        out_flat = out_flat[: x.size]
    return out_flat.reshape(orig_shape)


def identity(x: jax.Array, *, materialize_copy: bool = False) -> jax.Array:
    """Pallas-backed Identity.forward(input) -> input.

    Default path returns `x` unmodified (zero HBM traffic) — exactly matching
    the PyTorch module's semantics of returning the same tensor.  Pass
    materialize_copy=True only if an independent buffer is required.
    """
    if not materialize_copy:
        return x
    return identity_copy(x)


if __name__ == "__main__":
    key = jax.random.PRNGKey(0)
    # Small NCHW-style input consistent with a typical forward pass.
    x = jax.random.normal(key, (2, 4, 16, 16), dtype=jnp.float32)

    # Primary (optimal) path: identity returns the input untouched.
    y = identity(x)
    jax.block_until_ready(y)
    assert y.shape == x.shape and y.dtype == x.dtype
    assert bool(jnp.all(y == x))

    # Exercise the tuned Pallas copy kernel once (lane-dense, no-pad case).
    y_copy = identity(x, materialize_copy=True)
    jax.block_until_ready(y_copy)
    assert y_copy.shape == x.shape and y_copy.dtype == x.dtype
    assert bool(jnp.all(y_copy == x))

    # Exercise the padded fallback path (element count not a multiple of 128).
    x_odd = jax.random.normal(jax.random.PRNGKey(1), (3, 5, 7), dtype=jnp.float32)
    y_odd = identity(x_odd, materialize_copy=True)
    jax.block_until_ready(y_odd)
    assert y_odd.shape == x_odd.shape and bool(jnp.all(y_odd == x_odd))

    print("KERNEL_OK")
</pallas_src>

<mosaic_0001>
module attributes {stable_mosaic.version = 11 : i64} {
  func.func @_identity_kernel(%arg0: i32, %arg1: i32, %arg2: memref<1x2048xf32, #tpu.memory_space<vmem>>, %arg3: memref<1x2048xf32, #tpu.memory_space<vmem>>) attributes {dimension_semantics = [#tpu.dimension_semantics<parallel>, #tpu.dimension_semantics<parallel>], iteration_bounds = array<i64: 1, 1>, scalar_prefetch = 0 : i64, scratch_operands = 0 : i64, tpu.core_type = #tpu.core_type<tc>, window_params = [{transform_indices = @transform_0, window_bounds = array<i64: 1, 2048>}, {transform_indices = @transform_1, window_bounds = array<i64: 1, 2048>}]} {
    %c0 = arith.constant 0 : index
    %c0_0 = arith.constant 0 : index
    %0 = vector.load %arg2[%c0, %c0_0] : memref<1x2048xf32, #tpu.memory_space<vmem>>, vector<1x2048xf32>
    %c0_1 = arith.constant 0 : index
    %c0_2 = arith.constant 0 : index
    %1 = vector.load %arg3[%c0_1, %c0_2] : memref<1x2048xf32, #tpu.memory_space<vmem>>, vector<1x2048xf32>
    tpu.vector_store %arg3[%c0_1, %c0_2], %0 {strides = array<i32>} : memref<1x2048xf32, #tpu.memory_space<vmem>>, vector<1x2048xf32>,
    return
  }
  func.func @transform_0(%arg0: i32, %arg1: i32) -> (i32, i32) {
    %c0_i32 = arith.constant 0 : i32
    return %arg0, %arg1 : i32, i32
  }
  func.func @transform_1(%arg0: i32, %arg1: i32) -> (i32, i32) {
    %c0_i32 = arith.constant 0 : i32
    return %arg0, %arg1 : i32, i32
  }
}

</mosaic_0001>

<bundles_post_ra>
// kernel: tpu_custom_call.1
= control target key start
LH: loop header
LB: loop body
LE: loop exit
PB: predicated region body
PF: predicated region fallthrough
CT: control target
= control target key end

     0   :  { %6 = vsyncpa [#allocation3], 0  ;;  %s116_s0 = inlined_call_operand.hbm [shape: f32[1,2048], index: 0, kind: input, shape index: {}]   ;;  %s117_s1 = inlined_call_operand.hbm [shape: f32[1,2048], index: 1, kind: output, shape index: {}]  }
   0x1   :  { %7 = vsyncpa [#allocation4], 0  ;;  %s13_s8 = sshll.u32 %s116_s0, 4  ;;  %s98_s9 = smov [#allocation2]   ;;  %s14_s8 = int_to_ptr.hbm [resolvable:$true] %s13_s8 }
   0x2   :  { %s15_s10 = sshll.u32 %s98_s9, 4  ;;  %s16_s10 = int_to_ptr.vmem [resolvable:$true] %s15_s10 }
   0x3   :  { %18 = dma.hbm_to_vmem [thread:$0]  %s14_s8, 256, %s16_s10, [#allocation3]  }
   0x4   :  { %94 = dma.done.wait [#allocation3], 256  }
   0x5   :  { %95 = vsyncadd [#allocation3], 4294967040  ;;  %s99_s11 = smov [#allocation5]   ;;  %s34_s15 = sshll.u32 %s117_s1, 4  ;;  %v23_v0 = vld [vmem:[#allocation2] sm:$0xff]  ;;  %v24_v1 = vld [vmem:[#allocation2 + $0x8] sm:$0xff]  ;;  %s35_s15 = int_to_ptr.hbm [resolvable:$true] %s34_s15 }
   0x6   :  { %s32_s12 = sshll.u32 %s99_s11, 4  ;;  %25 = vst [vmem:[#allocation5] sm:$0xff] %v23_v0  ;;  %s33_s12 = int_to_ptr.vmem [resolvable:$true] %s32_s12 }
   0x7   :  { %26 = vst [vmem:[#allocation5 + $0x8] sm:$0xff] %v24_v1 }
   0x8   :  { %37 = dma.vmem_to_hbm [thread:$0]  %s33_s12, 256, %s35_s15, [#allocation4]  }
   0x9   :  { %96 = dma.done.wait [#allocation4], 256  }
   0xa   :  { %97 = vsyncadd [#allocation4], 4294967040 }
   0xb   :  { %42 = vsyncpa [#allocation3], 1 }
   0xc   :  { %43 = vsyncpa [#allocation4], 1 }

</bundles_post_ra>
